<compile_context>
chip_gen: v6e
topology: v6e:2x2x1
jax: 0.10.0
libtpu: 0.0.40
codegen_flags: <defaults>
</compile_context>

<pallas_src>
import jax
import jax.numpy as jnp
from jax.experimental import pallas as pl
from jax.experimental.pallas import tpu as pltpu

HID1 = 128                    # fc1 width
HID2 = 64                     # fc2 / stream hidden width
MATMUL_DTYPE = jnp.bfloat16   # MXU operand dtype; accumulation stays f32


# ---------------------------------------------------------------------------
# kernel
# ---------------------------------------------------------------------------

def dueling_dqn_kernel(state_ref,
                       w1_ref, b1_ref,
                       w2_ref, b2_ref,
                       ws1_ref, bs1_ref,
                       wq_ref, bq_ref,
                       out_ref):
    """One batch tile: 4 lane-dense matmuls; Q produced directly by matmul 4."""
    # cast on the VPU after the load (input stays f32 in HBM)
    x = state_ref[...].astype(MATMUL_DTYPE)                               # (TB, S)

    # shared trunk: fc1 -> relu -> fc2 -> relu  (bias/relu in f32)
    h1 = jnp.dot(x, w1_ref[...], preferred_element_type=jnp.float32) + b1_ref[...]
    h1 = jnp.maximum(h1, 0.0).astype(MATMUL_DTYPE)                        # (TB, 128)
    h2 = jnp.dot(h1, w2_ref[...], preferred_element_type=jnp.float32) + b2_ref[...]
    h2 = jnp.maximum(h2, 0.0).astype(MATMUL_DTYPE)                        # (TB, 64)

    # fused hidden of both streams: lanes [0:64] = adv hidden, [64:128] = val hidden
    s1 = jnp.dot(h2, ws1_ref[...], preferred_element_type=jnp.float32) + bs1_ref[...]
    s1 = jnp.maximum(s1, 0.0).astype(MATMUL_DTYPE)                        # (TB, 128)

    # dueling combine is pre-folded into (wq, bq): this matmul yields Q directly
    q = jnp.dot(s1, wq_ref[...], preferred_element_type=jnp.float32) + bq_ref[...]
    out_ref[...] = q                                                      # (TB, A) f32


# ---------------------------------------------------------------------------
# wrapper
# ---------------------------------------------------------------------------

def _pick_tile_b(B):
    """Pick a batch tile.  Large tiles amortize the ~0.35us/step grid overhead;
    keep >=2 grid steps for large batches so both v7x TensorCores get work.
    Returns (tile_b, padded_B)."""
    candidates = (2048, 1024, 512, 256, 128, 64, 32, 16, 8)
    for t in candidates:
        if B % t == 0 and (B // t >= 2 or B <= 256):
            return t, B
    for t in candidates:
        if B % t == 0:
            return t, B
    # ragged batch: zero-pad rows up to a multiple of a moderate tile
    if B >= 512:
        t = 512
    elif B >= 64:
        t = 64
    else:
        t = 8
    pad_b = ((B + t - 1) // t) * t
    return t, pad_b


def noisy_dueling_dqn(state, kparams, action_size):
    B, S = state.shape
    tile_b, pad_b = _pick_tile_b(B)
    if pad_b != B:
        state = jnp.pad(state, ((0, pad_b - B), (0, 0)))
    grid = (pad_b // tile_b,)

    row_map = lambda i: (i, 0)
    const_map = lambda i: (0, 0)

    in_specs = [
        pl.BlockSpec((tile_b, S), row_map),                # f32 state tile
        pl.BlockSpec(kparams["w1"].shape, const_map),      # weights stay VMEM-resident
        pl.BlockSpec(kparams["b1"].shape, const_map),
        pl.BlockSpec(kparams["w2"].shape, const_map),
        pl.BlockSpec(kparams["b2"].shape, const_map),
        pl.BlockSpec(kparams["ws1"].shape, const_map),
        pl.BlockSpec(kparams["bs1"].shape, const_map),
        pl.BlockSpec(kparams["wq"].shape, const_map),
        pl.BlockSpec(kparams["bq"].shape, const_map),
    ]
    # narrow output: last dim == full array dim (action_size), legal and ~A/128
    # of the old padded write traffic
    out_spec = pl.BlockSpec((tile_b, action_size), row_map)

    out = pl.pallas_call(
        dueling_dqn_kernel,
        out_shape=jax.ShapeDtypeStruct((pad_b, action_size), jnp.float32),
        grid=grid,
        in_specs=in_specs,
        out_specs=out_spec,
        compiler_params=pltpu.CompilerParams(
            # batch axis is embarrassingly parallel; on v7x one could use
            # pltpu.CORE_PARALLEL here to force the split across both TCs.
            dimension_semantics=("parallel",)),
    )(state, kparams["w1"], kparams["b1"], kparams["w2"], kparams["b2"],
      kparams["ws1"], kparams["bs1"], kparams["wq"], kparams["bq"])

    return out[:B] if pad_b != B else out


# ---------------------------------------------------------------------------
# deterministic parameter construction + fusion (plain-JAX glue)
# ---------------------------------------------------------------------------

def _linear_params(key, fan_in, fan_out):
    """nn.Linear default init: U(-1/sqrt(fan_in), 1/sqrt(fan_in))."""
    k_w, k_b = jax.random.split(key)
    bound = 1.0 / jnp.sqrt(jnp.float32(fan_in))
    w = jax.random.uniform(k_w, (fan_in, fan_out), jnp.float32, -bound, bound)
    b = jax.random.uniform(k_b, (1, fan_out), jnp.float32, -bound, bound)
    return w, b


def _noisy_linear_params(key, fan_in, fan_out, sigma0=0.5):
    """NoisyLinear (factorized Gaussian) folded to effective dense weight/bias."""
    k_wm, k_bm, k_ei, k_eo = jax.random.split(key, 4)
    bound = 1.0 / jnp.sqrt(jnp.float32(fan_in))
    w_mu = jax.random.uniform(k_wm, (fan_in, fan_out), jnp.float32, -bound, bound)
    b_mu = jax.random.uniform(k_bm, (1, fan_out), jnp.float32, -bound, bound)
    w_sigma = jnp.full((fan_in, fan_out), sigma0 / jnp.sqrt(jnp.float32(fan_in)), jnp.float32)
    b_sigma = jnp.full((1, fan_out), sigma0 / jnp.sqrt(jnp.float32(fan_in)), jnp.float32)

    f = lambda z: jnp.sign(z) * jnp.sqrt(jnp.abs(z))
    eps_in = f(jax.random.normal(k_ei, (fan_in,), jnp.float32))
    eps_out = f(jax.random.normal(k_eo, (fan_out,), jnp.float32))
    w_eps = jnp.outer(eps_in, eps_out)
    b_eps = eps_out[None, :]
    return w_mu + w_sigma * w_eps, b_mu + b_sigma * b_eps


def make_params(key, state_size, action_size):
    """Unfused f32 parameters (used by the pure-JAX reference)."""
    keys = jax.random.split(key, 6)
    w1, b1 = _linear_params(keys[0], state_size, HID1)
    w2, b2 = _linear_params(keys[1], HID1, HID2)
    wa1, ba1 = _noisy_linear_params(keys[2], HID2, HID2)
    wa2, ba2 = _noisy_linear_params(keys[3], HID2, action_size)
    wv1, bv1 = _noisy_linear_params(keys[4], HID2, HID2)
    wv2, bv2 = _noisy_linear_params(keys[5], HID2, 1)
    return dict(w1=w1, b1=b1, w2=w2, b2=b2,
                wa1=wa1, ba1=ba1, wa2=wa2, ba2=ba2,
                wv1=wv1, bv1=bv1, wv2=wv2, bv2=bv2)


def fuse_params(p, action_size):
    """Build the fused / combine-folded / bf16 parameters consumed by the kernel.

    Fused stream-1:  ws1 = [wa1 || wv1]  so one matmul computes both stream
    hiddens (lanes [0:64] adv, [64:128] val).

    Folded head:  Q = val + adv - mean_j(adv)  is linear in the head
    pre-activations, so
        Wq[0:64,  j] = wa2[:, j] - mean_k(wa2[:, k])
        Wq[64:128,j] = wv2[:, 0]
        bq[j]        = ba2[j] - mean(ba2) + bv2
    and the kernel's 4th matmul produces Q directly (no post-matmul reductions).
    """
    A = action_size
    ws1 = jnp.concatenate([p["wa1"], p["wv1"]], axis=1)                    # (64, 128)
    bs1 = jnp.concatenate([p["ba1"], p["bv1"]], axis=1)                    # (1, 128)

    wa2_centered = p["wa2"] - jnp.mean(p["wa2"], axis=1, keepdims=True)    # (64, A)
    wq = jnp.concatenate([wa2_centered, jnp.tile(p["wv2"], (1, A))], axis=0)  # (128, A)
    bq = p["ba2"] - jnp.mean(p["ba2"]) + p["bv2"][0, 0]                    # (1, A)

    return dict(
        w1=p["w1"].astype(MATMUL_DTYPE), b1=p["b1"],
        w2=p["w2"].astype(MATMUL_DTYPE), b2=p["b2"],
        ws1=ws1.astype(MATMUL_DTYPE), bs1=bs1,
        wq=wq.astype(MATMUL_DTYPE), bq=bq,
    )


def reference_forward(state, p):
    """Pure-JAX f32 reference of the PyTorch forward (sanity check)."""
    relu = lambda z: jnp.maximum(z, 0.0)
    x = relu(state @ p["w1"] + p["b1"])
    x = relu(x @ p["w2"] + p["b2"])
    adv = relu(x @ p["wa1"] + p["ba1"]) @ p["wa2"] + p["ba2"]
    val = relu(x @ p["wv1"] + p["bv1"]) @ p["wv2"] + p["bv2"]
    return val + adv - jnp.mean(adv, axis=1, keepdims=True)


if __name__ == "__main__":
    STATE_SIZE = 32
    ACTION_SIZE = 4
    BATCH = 8

    key = jax.random.PRNGKey(0)
    k_params, k_state = jax.random.split(key)
    params = make_params(k_params, STATE_SIZE, ACTION_SIZE)
    kparams = fuse_params(params, ACTION_SIZE)
    state = jax.random.normal(k_state, (BATCH, STATE_SIZE), jnp.float32)

    out = noisy_dueling_dqn(state, kparams, ACTION_SIZE)
    out = jax.block_until_ready(out)

    ref = reference_forward(state, params)
    assert out.shape == (BATCH, ACTION_SIZE)
    # bf16 matmul operands (f32 accumulation) + folded combine -> loose-but-safe
    # tolerance vs the f32 reference
    assert jnp.allclose(out, ref, atol=3e-2, rtol=3e-2), float(jnp.max(jnp.abs(out - ref)))

    print("KERNEL_OK")
</pallas_src>

<mosaic_0001>
module attributes {stable_mosaic.version = 11 : i64} {
  func.func @dueling_dqn_kernel(%arg0: i32, %arg1: memref<8x32xf32, #tpu.memory_space<vmem>>, %arg2: memref<32x128xbf16, #tpu.memory_space<vmem>>, %arg3: memref<1x128xf32, #tpu.memory_space<vmem>>, %arg4: memref<128x64xbf16, #tpu.memory_space<vmem>>, %arg5: memref<1x64xf32, #tpu.memory_space<vmem>>, %arg6: memref<64x128xbf16, #tpu.memory_space<vmem>>, %arg7: memref<1x128xf32, #tpu.memory_space<vmem>>, %arg8: memref<128x4xbf16, #tpu.memory_space<vmem>>, %arg9: memref<1x4xf32, #tpu.memory_space<vmem>>, %arg10: memref<8x4xf32, #tpu.memory_space<vmem>>) attributes {dimension_semantics = [#tpu.dimension_semantics<parallel>], iteration_bounds = array<i64: 1>, scalar_prefetch = 0 : i64, scratch_operands = 0 : i64, tpu.core_type = #tpu.core_type<tc>, window_params = [{transform_indices = @transform_0, window_bounds = array<i64: 8, 32>}, {pipeline_mode = #tpu.pipeline_mode<synchronous>, transform_indices = @transform_1, window_bounds = array<i64: 32, 128>}, {pipeline_mode = #tpu.pipeline_mode<synchronous>, transform_indices = @transform_2, window_bounds = array<i64: 1, 128>}, {pipeline_mode = #tpu.pipeline_mode<synchronous>, transform_indices = @transform_3, window_bounds = array<i64: 128, 64>}, {pipeline_mode = #tpu.pipeline_mode<synchronous>, transform_indices = @transform_4, window_bounds = array<i64: 1, 64>}, {pipeline_mode = #tpu.pipeline_mode<synchronous>, transform_indices = @transform_5, window_bounds = array<i64: 64, 128>}, {pipeline_mode = #tpu.pipeline_mode<synchronous>, transform_indices = @transform_6, window_bounds = array<i64: 1, 128>}, {pipeline_mode = #tpu.pipeline_mode<synchronous>, transform_indices = @transform_7, window_bounds = array<i64: 128, 4>}, {pipeline_mode = #tpu.pipeline_mode<synchronous>, transform_indices = @transform_8, window_bounds = array<i64: 1, 4>}, {transform_indices = @transform_9, window_bounds = array<i64: 8, 4>}]} {
    %c0 = arith.constant 0 : index
    %c0_0 = arith.constant 0 : index
    %0 = vector.load %arg1[%c0, %c0_0] : memref<8x32xf32, #tpu.memory_space<vmem>>, vector<8x32xf32>
    %1 = arith.truncf %0 : vector<8x32xf32> to vector<8x32xbf16>
    %c0_1 = arith.constant 0 : index
    %c0_2 = arith.constant 0 : index
    %2 = vector.load %arg2[%c0_1, %c0_2] : memref<32x128xbf16, #tpu.memory_space<vmem>>, vector<32x128xbf16>
    %cst = arith.constant dense<0.000000e+00> : vector<8x128xf32>
    %3 = tpu.matmul %1, %2, %cst {dimension_numbers = #tpu.dot_dimension_numbers<[1], [0], [0], [1], [0, 0, 1, 1], [], []>} : vector<8x32xbf16>, vector<32x128xbf16>, vector<8x128xf32> -> vector<8x128xf32>
    %c0_3 = arith.constant 0 : index
    %c0_4 = arith.constant 0 : index
    %4 = vector.load %arg3[%c0_3, %c0_4] : memref<1x128xf32, #tpu.memory_space<vmem>>, vector<1x128xf32>
    %5 = vector.broadcast %4 : vector<1x128xf32> to vector<8x128xf32>
    %6 = arith.addf %3, %5 : vector<8x128xf32>
    %cst_5 = arith.constant 0.000000e+00 : f32
    %7 = vector.broadcast %cst_5 : f32 to vector<8x128xf32>
    %8 = arith.maximumf %6, %7 : vector<8x128xf32>
    %9 = arith.truncf %8 : vector<8x128xf32> to vector<8x128xbf16>
    %c0_6 = arith.constant 0 : index
    %c0_7 = arith.constant 0 : index
    %10 = vector.load %arg4[%c0_6, %c0_7] : memref<128x64xbf16, #tpu.memory_space<vmem>>, vector<128x64xbf16>
    %cst_8 = arith.constant dense<0.000000e+00> : vector<8x64xf32>
    %11 = tpu.matmul %9, %10, %cst_8 {dimension_numbers = #tpu.dot_dimension_numbers<[1], [0], [0], [1], [0, 0, 1, 1], [], []>} : vector<8x128xbf16>, vector<128x64xbf16>, vector<8x64xf32> -> vector<8x64xf32>
    %c0_9 = arith.constant 0 : index
    %c0_10 = arith.constant 0 : index
    %12 = vector.load %arg5[%c0_9, %c0_10] : memref<1x64xf32, #tpu.memory_space<vmem>>, vector<1x64xf32>
    %13 = vector.broadcast %12 : vector<1x64xf32> to vector<8x64xf32>
    %14 = arith.addf %11, %13 : vector<8x64xf32>
    %cst_11 = arith.constant 0.000000e+00 : f32
    %15 = vector.broadcast %cst_11 : f32 to vector<8x64xf32>
    %16 = arith.maximumf %14, %15 : vector<8x64xf32>
    %17 = arith.truncf %16 : vector<8x64xf32> to vector<8x64xbf16>
    %c0_12 = arith.constant 0 : index
    %c0_13 = arith.constant 0 : index
    %18 = vector.load %arg6[%c0_12, %c0_13] : memref<64x128xbf16, #tpu.memory_space<vmem>>, vector<64x128xbf16>
    %cst_14 = arith.constant dense<0.000000e+00> : vector<8x128xf32>
    %19 = tpu.matmul %17, %18, %cst_14 {dimension_numbers = #tpu.dot_dimension_numbers<[1], [0], [0], [1], [0, 0, 1, 1], [], []>} : vector<8x64xbf16>, vector<64x128xbf16>, vector<8x128xf32> -> vector<8x128xf32>
    %c0_15 = arith.constant 0 : index
    %c0_16 = arith.constant 0 : index
    %20 = vector.load %arg7[%c0_15, %c0_16] : memref<1x128xf32, #tpu.memory_space<vmem>>, vector<1x128xf32>
    %21 = vector.broadcast %20 : vector<1x128xf32> to vector<8x128xf32>
    %22 = arith.addf %19, %21 : vector<8x128xf32>
    %cst_17 = arith.constant 0.000000e+00 : f32
    %23 = vector.broadcast %cst_17 : f32 to vector<8x128xf32>
    %24 = arith.maximumf %22, %23 : vector<8x128xf32>
    %25 = arith.truncf %24 : vector<8x128xf32> to vector<8x128xbf16>
    %c0_18 = arith.constant 0 : index
    %c0_19 = arith.constant 0 : index
    %26 = vector.load %arg8[%c0_18, %c0_19] : memref<128x4xbf16, #tpu.memory_space<vmem>>, vector<128x4xbf16>
    %cst_20 = arith.constant dense<0.000000e+00> : vector<8x4xf32>
    %27 = tpu.matmul %25, %26, %cst_20 {dimension_numbers = #tpu.dot_dimension_numbers<[1], [0], [0], [1], [0, 0, 1, 1], [], []>} : vector<8x128xbf16>, vector<128x4xbf16>, vector<8x4xf32> -> vector<8x4xf32>
    %c0_21 = arith.constant 0 : index
    %c0_22 = arith.constant 0 : index
    %28 = vector.load %arg9[%c0_21, %c0_22] : memref<1x4xf32, #tpu.memory_space<vmem>>, vector<1x4xf32>
    %29 = vector.broadcast %28 : vector<1x4xf32> to vector<8x4xf32>
    %30 = arith.addf %27, %29 : vector<8x4xf32>
    %c0_23 = arith.constant 0 : index
    %c0_24 = arith.constant 0 : index
    %31 = vector.load %arg10[%c0_23, %c0_24] : memref<8x4xf32, #tpu.memory_space<vmem>>, vector<8x4xf32>
    tpu.vector_store %arg10[%c0_23, %c0_24], %30 {strides = array<i32>} : memref<8x4xf32, #tpu.memory_space<vmem>>, vector<8x4xf32>,
    return
  }
  func.func @transform_0(%arg0: i32) -> (i32, i32) {
    %c0_i32 = arith.constant 0 : i32
    %c0_i32_0 = arith.constant 0 : i32
    return %arg0, %c0_i32 : i32, i32
  }
  func.func @transform_1(%arg0: i32) -> (i32, i32) {
    %c0_i32 = arith.constant 0 : i32
    %c0_i32_0 = arith.constant 0 : i32
    %c0_i32_1 = arith.constant 0 : i32
    return %c0_i32, %c0_i32_0 : i32, i32
  }
  func.func @transform_2(%arg0: i32) -> (i32, i32) {
    %c0_i32 = arith.constant 0 : i32
    %c0_i32_0 = arith.constant 0 : i32
    %c0_i32_1 = arith.constant 0 : i32
    return %c0_i32, %c0_i32_0 : i32, i32
  }
  func.func @transform_3(%arg0: i32) -> (i32, i32) {
    %c0_i32 = arith.constant 0 : i32
    %c0_i32_0 = arith.constant 0 : i32
    %c0_i32_1 = arith.constant 0 : i32
    return %c0_i32, %c0_i32_0 : i32, i32
  }
  func.func @transform_4(%arg0: i32) -> (i32, i32) {
    %c0_i32 = arith.constant 0 : i32
    %c0_i32_0 = arith.constant 0 : i32
    %c0_i32_1 = arith.constant 0 : i32
    return %c0_i32, %c0_i32_0 : i32, i32
  }
  func.func @transform_5(%arg0: i32) -> (i32, i32) {
    %c0_i32 = arith.constant 0 : i32
    %c0_i32_0 = arith.constant 0 : i32
    %c0_i32_1 = arith.constant 0 : i32
    return %c0_i32, %c0_i32_0 : i32, i32
  }
  func.func @transform_6(%arg0: i32) -> (i32, i32) {
    %c0_i32 = arith.constant 0 : i32
    %c0_i32_0 = arith.constant 0 : i32
    %c0_i32_1 = arith.constant 0 : i32
    return %c0_i32, %c0_i32_0 : i32, i32
  }
  func.func @transform_7(%arg0: i32) -> (i32, i32) {
    %c0_i32 = arith.constant 0 : i32
    %c0_i32_0 = arith.constant 0 : i32
    %c0_i32_1 = arith.constant 0 : i32
    return %c0_i32, %c0_i32_0 : i32, i32
  }
  func.func @transform_8(%arg0: i32) -> (i32, i32) {
    %c0_i32 = arith.constant 0 : i32
    %c0_i32_0 = arith.constant 0 : i32
    %c0_i32_1 = arith.constant 0 : i32
    return %c0_i32, %c0_i32_0 : i32, i32
  }
  func.func @transform_9(%arg0: i32) -> (i32, i32) {
    %c0_i32 = arith.constant 0 : i32
    %c0_i32_0 = arith.constant 0 : i32
    return %arg0, %c0_i32 : i32, i32
  }
}

</mosaic_0001>

<bundles_post_ra>
// kernel: tpu_custom_call.1
= control target key start
LH: loop header
LB: loop body
LE: loop exit
PB: predicated region body
PF: predicated region fallthrough
CT: control target
= control target key end

     0   :  { %v557_v0 = vmov 0.0   ;;  %vm558_vm0 = vmmov 0   ;;  %vm58_vm1 = vcmask 261120   ;;  %vm256_vm2 = vcmask 523264   ;;  %s723_s1 = inlined_call_operand.vmem [shape: bf16[32,128], index: 1, kind: input, shape index: {}]   ;;  %s724_s0 = inlined_call_operand.vmem [shape: f32[8,32], index: 0, kind: input, shape index: {}]   ;;  %s725_s3 = inlined_call_operand.vmem [shape: bf16[128,64], index: 3, kind: input, shape index: {}]   ;;  %s726_s5 = inlined_call_operand.vmem [shape: bf16[64,128], index: 5, kind: input, shape index: {}]   ;;  %s727_s2 = inlined_call_operand.vmem [shape: f32[1,128], index: 2, kind: input, shape index: {}]   ;;  %s728_s7 = inlined_call_operand.vmem [shape: bf16[128,4], index: 7, kind: input, shape index: {}]   ;;  %s729_s4 = inlined_call_operand.vmem [shape: f32[1,64], index: 4, kind: input, shape index: {}]   ;;  %s730_s6 = inlined_call_operand.vmem [shape: f32[1,128], index: 6, kind: input, shape index: {}]   ;;  %s731_s8 = inlined_call_operand.vmem [shape: f32[1,4], index: 8, kind: input, shape index: {}]   ;;  %s732_s9 = inlined_call_operand.vmem [shape: f32[8,4], index: 9, kind: output, shape index: {}]  }
   0x1   :  { %473 = vmatprep.subr.bf16.mxu1 %v557_v0  ;;  %v535_v1 = vld [vmem:[%s723_s1 + $0x8] sm:$0xff]   ;;  %477 = vmatprep.mubr.msk.bf16.mxu1 %vm558_vm0, %v557_v0  ;;  %v536_v2 = vld [vmem:[%s723_s1] sm:$0xff]   ;;  %v537_v5 = vld [vmem:[%s725_s3 + $0x38] sm:$0xff]   ;;  %vm413_vm3 = vcmask 31744  }
   0x2   :  { %501 = vmatprep.subr.bf16.mxu0 %v557_v0  ;;  %509 = vmatprep.mubr.msk.bf16.mxu0 %vm558_vm0, %v557_v0  ;;  %v33_v3 = vld [vmem:[%s724_s0] sm:$0xff]  ;;  %v538_v6 = vld [vmem:[%s725_s3 + $0x30] sm:$0xff]   ;;  %v539_v7 = vld [vmem:[%s725_s3 + $0x28] sm:$0xff]  }
   0x3   :  { %474 = vmatpush3.bf16.msra.mxu1 %v535_v1  ;;  %v34_v4 = vpack.c.bf16 %v33_v3, %v33_v3  ;;  %v540_v8 = vld [vmem:[%s725_s3 + $0x20] sm:$0xff]   ;;  %v541_v9 = vld [vmem:[%s725_s3 + $0x18] sm:$0xff]   ;;  %v542_v10 = vld [vmem:[%s725_s3 + $0x10] sm:$0xff]  }
   0x4   :  { %475 = vmatprep.subr.bf16.mxu1 %v557_v0  ;;  %v543_v11 = vld [vmem:[%s725_s3 + $0x8] sm:$0xff]   ;;  %v544_v12 = vld [vmem:[%s725_s3] sm:$0xff]   ;;  %v545_v13 = vld [vmem:[%s726_s5 + $0x18] sm:$0xff]  }
   0x5   :  { %502 = vmatpush3.bf16.msra.mxu0 %v545_v13  ;;  %v546_v14 = vld [vmem:[%s726_s5 + $0x10] sm:$0xff]   ;;  %v419_v15 = vld [vmem:[%s727_s2] ss:$0 sm:$0xff]  ;;  %v547_v23 = vld [vmem:[%s726_s5 + $0x8] sm:$0xff]  }
   0x6   :  { %503 = vmatprep.subr.bf16.mxu0 %v557_v0  ;;  %v548_v24 = vld [vmem:[%s726_s5] sm:$0xff]   ;;  %v549_v31 = vld [vmem:[%s728_s7 + $0x38] sm:$0xff]   ;;  %v550_v34 = vld [vmem:[%s728_s7 + $0x30] sm:$0xff]  }
   0x7   :  { %476 = vmatpush3.bf16.msra.mxu1 %v536_v2  ;;  %v423_v25 = vld [vmem:[%s729_s4] ss:$0 sm:$0xff]  ;;  %v551_v35 = vld [vmem:[%s728_s7 + $0x28] sm:$0xff]   ;;  %v553_v37 = vld [vmem:[%s728_s7 + $0x18] sm:$0xff]  }
   0x8   :  { %481 = vmatprep.subr.bf16.mxu1 %v557_v0  ;;  %v552_v36 = vld [vmem:[%s728_s7 + $0x20] sm:$0xff]   ;;  %v554_v38 = vld [vmem:[%s728_s7 + $0x10] sm:$0xff]   ;;  %v555_v39 = vld [vmem:[%s728_s7 + $0x8] sm:$0xff]  }
   0x9   :  { %504 = vmatpush3.bf16.msra.mxu0 %v546_v14  ;;  %v556_v40 = vld [vmem:[%s728_s7] sm:$0xff]  }
   0xa   :  { %478 = vmatmul.mubr.msk.bf16.vlgmr.msra.gmra.mxu1 %vm58_vm1, %v34_v4  ;;  %505 = vmatprep.subr.bf16.mxu0 %v557_v0  ;;  %v432_v41 = vld [vmem:[%s730_s6] ss:$0 sm:$0xff] }
   0xb   :  { %482 = vmatpush3.bf16.msra.mxu1 %v537_v5  ;;  %497 = vmatprep.mubr.msk.bf16.mxu1 %vm558_vm0, %v557_v0  ;;  %v438_v49 = vld [vmem:[%s731_s8] ss:$0 sm:$0xff] }
   0xc   :  { %483 = vmatprep.subr.bf16.mxu1 %v557_v0 }
   0xd   :  { %506 = vmatpush3.bf16.msra.mxu0 %v547_v23 }
   0xe   :  { %507 = vmatprep.subr.bf16.mxu0 %v557_v0 }
   0xf   :  { %484 = vmatpush3.bf16.msra.mxu1 %v538_v6 }
  0x10   :  { %485 = vmatprep.subr.bf16.mxu1 %v557_v0 }
  0x11   :  { %508 = vmatpush3.bf16.msra.mxu0 %v548_v24 }
  0x12   :  { %513 = vmatprep.subr.bf16.mxu0 %v557_v0 }
  0x13   :  { %486 = vmatpush3.bf16.msra.mxu1 %v539_v7 }
  0x14   :  { %487 = vmatprep.subr.bf16.mxu1 %v557_v0 }
  0x17   :  { %488 = vmatpush3.bf16.msra.mxu1 %v540_v8 }
  0x18   :  { %489 = vmatprep.subr.bf16.mxu1 %v557_v0 }
  0x1b   :  { %490 = vmatpush3.bf16.msra.mxu1 %v541_v9 }
  0x1c   :  { %491 = vmatprep.subr.bf16.mxu1 %v557_v0 }
  0x1f   :  { %492 = vmatpush3.bf16.msra.mxu1 %v542_v10 }
  0x20   :  { %493 = vmatprep.subr.bf16.mxu1 %v557_v0 }
  0x23   :  { %494 = vmatpush3.bf16.msra.mxu1 %v543_v11 }
  0x24   :  { %495 = vmatprep.subr.bf16.mxu1 %v557_v0 }
  0x27   :  { %496 = vmatpush3.bf16.msra.mxu1 %v544_v12 }
  0xca   :  { %v96_v16 = vpop.f32.mrf.mxu1 }
  0xcb   :  { %v97_v17 = vadd.f32 %v419_v15, %v96_v16 }
  0xcc   :  { %v479_v18 = vpop.f32.mrf.mxu1 }
  0xcd   :  { %v102_v19 = vmax.f32 %v97_v17, 0.0 }
  0xce   :  { %v99_v20 = vpop.f32.mrf.mxu1 }
  0xcf   :  { %v103_v21 = vpack.c.bf16 %v102_v19, %v102_v19 }
  0xd0   :  { %v480_v22 = vpop.f32.mrf.mxu1 }
  0xd1   :  { %498 = vmatmul.mubr.bf16.vlgmr.msra.gmra.mxu1 %v103_v21 }
 0x191   :  { %v209_v26 = vpop.f32.mrf.mxu1 }
 0x192   :  { %v210_v27 = vadd.f32 %v423_v25, %v209_v26 }
 0x193   :  { %v499_v28 = vpop.f32.mrf.mxu1 }
 0x194   :  { %v215_v29 = vmax.f32 %v210_v27, 0.0 }
 0x195   :  { %v212_v30 = vpop.f32.mrf.mxu1 }
 0x196   :  { %v216_v32 = vpack.c.bf16 %v215_v29, %v215_v29 }
 0x197   :  { %v500_v33 = vpop.f32.mrf.mxu1 }
 0x198   :  { %510 = vmatmul.mubr.msk.bf16.vlgmr.msra.gmra.mxu0 %vm256_vm2, %v216_v32 }
 0x199   :  { %514 = vmatpush3.bf16.msra.mxu0 %v549_v31  ;;  %529 = vmatprep.mubr.msk.bf16.mxu0 %vm558_vm0, %v557_v0 }
 0x19a   :  { %515 = vmatprep.subr.bf16.mxu0 %v557_v0 }
 0x19d   :  { %516 = vmatpush3.bf16.msra.mxu0 %v550_v34 }
 0x19e   :  { %517 = vmatprep.subr.bf16.mxu0 %v557_v0 }
 0x1a1   :  { %518 = vmatpush3.bf16.msra.mxu0 %v551_v35 }
 0x1a2   :  { %519 = vmatprep.subr.bf16.mxu0 %v557_v0 }
 0x1a5   :  { %520 = vmatpush3.bf16.msra.mxu0 %v552_v36 }
 0x1a6   :  { %521 = vmatprep.subr.bf16.mxu0 %v557_v0 }
 0x1a9   :  { %522 = vmatpush3.bf16.msra.mxu0 %v553_v37 }
 0x1aa   :  { %523 = vmatprep.subr.bf16.mxu0 %v557_v0 }
 0x1ad   :  { %524 = vmatpush3.bf16.msra.mxu0 %v554_v38 }
 0x1ae   :  { %525 = vmatprep.subr.bf16.mxu0 %v557_v0 }
 0x1b1   :  { %526 = vmatpush3.bf16.msra.mxu0 %v555_v39 }
 0x1b2   :  { %527 = vmatprep.subr.bf16.mxu0 %v557_v0 }
 0x1b5   :  { %528 = vmatpush3.bf16.msra.mxu0 %v556_v40 }
 0x258   :  { %v294_v42 = vpop.f32.mrf.mxu0 }
 0x259   :  { %v295_v43 = vadd.f32 %v432_v41, %v294_v42 }
 0x25a   :  { %v511_v44 = vpop.f32.mrf.mxu0 }
 0x25b   :  { %v300_v45 = vmax.f32 %v295_v43, 0.0 }
 0x25c   :  { %v297_v46 = vpop.f32.mrf.mxu0 }
 0x25d   :  { %v301_v47 = vpack.c.bf16 %v300_v45, %v300_v45 }
 0x25e   :  { %v512_v48 = vpop.f32.mrf.mxu0 }
 0x25f   :  { %530 = vmatmul.mubr.bf16.vlgmr.msra.gmra.mxu0 %v301_v47 }
 0x31f   :  { %v407_v50 = vpop.f32.mrf.mxu0 }
 0x320   :  { %v408_v51 = vadd.f32 %v438_v49, %v407_v50 }
 0x321   :  { %v531_v52 = vpop.f32.mrf.mxu0 }
 0x322   :  { %414 = vst.msk [vmem:[%s732_s9] sm:$0xff] %vm413_vm3, %v408_v51 }
 0x323   :  { %v410_v53 = vpop.f32.mrf.mxu0 }
 0x325   :  { %v532_v54 = vpop.f32.mrf.mxu0 }

</bundles_post_ra>
